<compile_context>
chip_gen: v6e
topology: v6e:2x2x1
jax: 0.10.0
libtpu: 0.0.40
codegen_flags: <defaults>
</compile_context>

<pallas_src>
import jax
import jax.numpy as jnp
from jax.experimental import pallas as pl
from jax.experimental.pallas import tpu as pltpu


def _round_up(n: int, m: int) -> int:
    return ((n + m - 1) // m) * m


# ---------------------------------------------------------------------------
# Kernels
# ---------------------------------------------------------------------------
def _linear_kernel_noacc(x_ref, w_ref, b_ref, o_ref):
    """Single-K-step (or gridless) kernel: dot + bias, write output directly."""
    o_ref[...] = (
        jnp.dot(x_ref[...], w_ref[...], preferred_element_type=jnp.float32)
        + b_ref[...]
    ).astype(o_ref.dtype)


def _linear_kernel_acc(x_ref, w_ref, b_ref, o_ref, acc_ref):
    """Multi-K-step kernel: f32 VMEM accumulator over the innermost K axis."""
    k = pl.program_id(2)

    @pl.when(k == 0)
    def _():
        acc_ref[...] = jnp.zeros_like(acc_ref)

    acc_ref[...] += jnp.dot(
        x_ref[...], w_ref[...], preferred_element_type=jnp.float32)

    @pl.when(k == pl.num_programs(2) - 1)
    def _():
        o_ref[...] = (acc_ref[...] + b_ref[...]).astype(o_ref.dtype)


# ---------------------------------------------------------------------------
# pallas_call wrappers
# ---------------------------------------------------------------------------
def _single_block_linear(x2, w_t, b2, *, out_dtype):
    """Gridless path: whole arrays are single VMEM blocks (no padding)."""
    M = x2.shape[0]
    O = w_t.shape[1]
    return pl.pallas_call(
        _linear_kernel_noacc,
        out_shape=jax.ShapeDtypeStruct((M, O), out_dtype),
    )(x2, w_t, b2)


def _tiled_linear(x_p, w_p, b_p, *, tm, tn, tk, out_dtype):
    """Tiled path on pre-padded inputs: x_p (Mp,Kp), w_p (Kp,Np), b_p (1,Np)."""
    M_pad, K_pad = x_p.shape
    N_pad = w_p.shape[1]
    grid = (M_pad // tm, N_pad // tn, K_pad // tk)
    single_k = grid[2] == 1

    itemsize = jnp.dtype(x_p.dtype).itemsize
    # Double-buffered x/w/out tiles + f32 accumulator.
    est = 2 * (tm * tk + tk * tn + tm * tn) * itemsize + tm * tn * 4
    vmem_limit = int(min(max(2 * est, 32 << 20), 60 << 20))

    kernel = _linear_kernel_noacc if single_k else _linear_kernel_acc
    scratch = [] if single_k else [pltpu.VMEM((tm, tn), jnp.float32)]

    return pl.pallas_call(
        kernel,
        out_shape=jax.ShapeDtypeStruct((M_pad, N_pad), out_dtype),
        grid_spec=pltpu.PrefetchScalarGridSpec(
            num_scalar_prefetch=0,
            grid=grid,
            in_specs=[
                pl.BlockSpec((tm, tk), lambda i, j, k: (i, k)),   # activations
                pl.BlockSpec((tk, tn), lambda i, j, k: (k, j)),   # weight.T
                pl.BlockSpec((1, tn), lambda i, j, k: (0, j)),    # bias
            ],
            out_specs=pl.BlockSpec((tm, tn), lambda i, j, k: (i, j)),
            scratch_shapes=scratch,
        ),
        compiler_params=pltpu.CompilerParams(
            # K must stay the innermost ("arbitrary") axis: the accumulator is
            # re-initialised at k==0 and flushed at the last k step per (i, j).
            dimension_semantics=("parallel", "parallel", "arbitrary"),
            vmem_limit_bytes=vmem_limit,
        ),
    )(x_p, w_p, b_p)


# ---------------------------------------------------------------------------
# Module equivalent
# ---------------------------------------------------------------------------
class DecoderLinearLayer:
    """Pallas equivalent of `nn.Linear(embedding_dim, out_dimension)`.

    Weight transpose / cast / padding happen once here, not per forward call.
    """

    def __init__(self, weight, bias, *, compute_dtype=jnp.float32,
                 out_dtype=jnp.float32, tile_m=256, tile_n=512, tile_k=1024):
        weight = jnp.asarray(weight)
        bias = jnp.asarray(bias)
        self.out_dim, self.emb_dim = weight.shape
        self.compute_dtype = compute_dtype
        self.out_dtype = out_dtype
        self.tile_m = tile_m

        # N/K tile sizes depend only on (O, E): fix them (and padding) now.
        self.tn = min(tile_n, _round_up(self.out_dim, 128))
        self.tk = min(tile_k, _round_up(self.emb_dim, 128))
        self.n_pad = _round_up(self.out_dim, self.tn)
        self.k_pad = _round_up(self.emb_dim, self.tk)

        # One-time lane-dense transposed weight (E, O) + f32 bias row.
        self.w_t = weight.T.astype(compute_dtype)
        self.b2 = bias.reshape(1, self.out_dim).astype(jnp.float32)
        # One-time padded versions for the tiled path.
        self.w_pad = jnp.pad(
            self.w_t,
            ((0, self.k_pad - self.emb_dim), (0, self.n_pad - self.out_dim)))
        self.b_pad = jnp.pad(self.b2, ((0, 0), (0, self.n_pad - self.out_dim)))

        self._single_block_budget = 8 << 20  # bytes of VMEM for gridless path

    def __call__(self, x):
        lead = x.shape[:-1]
        E, O = self.emb_dim, self.out_dim
        x2 = x.reshape(-1, E).astype(self.compute_dtype)
        M = x2.shape[0]
        itemsize = jnp.dtype(self.compute_dtype).itemsize

        single_bytes = (M * E + E * O + M * O) * itemsize + 4 * O
        if (M <= self.tile_m and E <= self.tk and O <= self.tn
                and single_bytes <= self._single_block_budget):
            # Gridless fast path: one block, no padding, no grid overhead.
            out = _single_block_linear(x2, self.w_t, self.b2,
                                       out_dtype=self.out_dtype)
        else:
            tm = min(self.tile_m, _round_up(M, 8))
            m_pad = _round_up(M, tm)
            if m_pad == M and self.k_pad == E:
                x_p = x2
            else:
                x_p = jnp.pad(x2, ((0, m_pad - M), (0, self.k_pad - E)))
            out = _tiled_linear(x_p, self.w_pad, self.b_pad,
                                tm=tm, tn=self.tn, tk=self.tk,
                                out_dtype=self.out_dtype)
            if m_pad != M or self.n_pad != O:
                out = out[:M, :O]

        return out.reshape(*lead, O)


def decoder_linear_layer(x, weight, bias, **kwargs):
    """One-shot convenience wrapper (prepares weights on every call)."""
    return DecoderLinearLayer(weight, bias, **kwargs)(x)


# ---------------------------------------------------------------------------
# Self-test
# ---------------------------------------------------------------------------
if __name__ == "__main__":
    key = jax.random.PRNGKey(0)
    k_x, k_w, k_b, k_x2, k_w2, k_b2 = jax.random.split(key, 6)

    # --- Test 1: small shapes consistent with the module (gridless path) ---
    embedding_dim, out_dimension = 32, 16
    B, S = 2, 8
    x = jax.random.normal(k_x, (B, S, embedding_dim), dtype=jnp.float32)
    bound = 1.0 / (embedding_dim ** 0.5)
    weight = jax.random.uniform(k_w, (out_dimension, embedding_dim),
                                minval=-bound, maxval=bound, dtype=jnp.float32)
    bias = jax.random.uniform(k_b, (out_dimension,), minval=-bound,
                              maxval=bound, dtype=jnp.float32)

    layer = DecoderLinearLayer(weight, bias)
    out = jax.block_until_ready(layer(x))
    ref = jnp.einsum("bse,oe->bso", x, weight) + bias
    assert out.shape == (B, S, out_dimension)
    assert jnp.allclose(out, ref, atol=1e-4, rtol=1e-4), "fast path mismatch"

    # --- Test 2: tiled multi-K accumulator path (bf16 compute, f32 acc) ----
    M2, E2, O2 = 250, 1152, 320
    x_big = jax.random.normal(k_x2, (M2, E2), dtype=jnp.float32)
    bound2 = 1.0 / (E2 ** 0.5)
    w_big = jax.random.uniform(k_w2, (O2, E2), minval=-bound2, maxval=bound2,
                               dtype=jnp.float32)
    b_big = jax.random.uniform(k_b2, (O2,), minval=-bound2, maxval=bound2,
                               dtype=jnp.float32)
    layer2 = DecoderLinearLayer(w_big, b_big, compute_dtype=jnp.bfloat16,
                                tile_m=128, tile_n=128, tile_k=512)
    out2 = jax.block_until_ready(layer2(x_big))
    ref2 = jnp.dot(x_big.astype(jnp.bfloat16), w_big.T.astype(jnp.bfloat16),
                   preferred_element_type=jnp.float32) + b_big
    assert out2.shape == (M2, O2)
    assert jnp.allclose(out2, ref2, atol=5e-3, rtol=5e-3), "tiled path mismatch"

    print("KERNEL_OK")
</pallas_src>

<mosaic_0001>
module attributes {stable_mosaic.version = 11 : i64} {
  func.func @_linear_kernel_noacc(%arg0: memref<16x32xf32, #tpu.memory_space<vmem>>, %arg1: memref<32x16xf32, #tpu.memory_space<vmem>>, %arg2: memref<1x16xf32, #tpu.memory_space<vmem>>, %arg3: memref<16x16xf32, #tpu.memory_space<vmem>>) attributes {dimension_semantics = [], scalar_prefetch = 0 : i64, scratch_operands = 0 : i64, tpu.core_type = #tpu.core_type<tc>} {
    %c0 = arith.constant 0 : index
    %c0_0 = arith.constant 0 : index
    %0 = vector.load %arg0[%c0, %c0_0] : memref<16x32xf32, #tpu.memory_space<vmem>>, vector<16x32xf32>
    %c0_1 = arith.constant 0 : index
    %c0_2 = arith.constant 0 : index
    %1 = vector.load %arg1[%c0_1, %c0_2] : memref<32x16xf32, #tpu.memory_space<vmem>>, vector<32x16xf32>
    %cst = arith.constant dense<0.000000e+00> : vector<16x16xf32>
    %2 = tpu.matmul %0, %1, %cst {dimension_numbers = #tpu.dot_dimension_numbers<[1], [0], [0], [1], [0, 0, 1, 1], [], []>} : vector<16x32xf32>, vector<32x16xf32>, vector<16x16xf32> -> vector<16x16xf32>
    %c0_3 = arith.constant 0 : index
    %c0_4 = arith.constant 0 : index
    %3 = vector.load %arg2[%c0_3, %c0_4] : memref<1x16xf32, #tpu.memory_space<vmem>>, vector<1x16xf32>
    %4 = vector.broadcast %3 : vector<1x16xf32> to vector<16x16xf32>
    %5 = arith.addf %2, %4 : vector<16x16xf32>
    %c0_5 = arith.constant 0 : index
    %c0_6 = arith.constant 0 : index
    %6 = vector.load %arg3[%c0_5, %c0_6] : memref<16x16xf32, #tpu.memory_space<vmem>>, vector<16x16xf32>
    tpu.vector_store %arg3[%c0_5, %c0_6], %5 {strides = array<i32>} : memref<16x16xf32, #tpu.memory_space<vmem>>, vector<16x16xf32>,
    return
  }
}

</mosaic_0001>

<bundles_post_ra>
// kernel: tpu_custom_call.1
= control target key start
LH: loop header
LB: loop body
LE: loop exit
PB: predicated region body
PF: predicated region fallthrough
CT: control target
= control target key end

     0   :  { %vm28_vm0 = vcmask 261120   ;;  %s221_s0 = inlined_call_operand.vmem [shape: f32[16,32], index: 0, kind: input, shape index: {}]   ;;  %s222_s1 = inlined_call_operand.vmem [shape: f32[32,16], index: 1, kind: input, shape index: {}]   ;;  %s223_s2 = inlined_call_operand.vmem [shape: f32[1,16], index: 2, kind: input, shape index: {}]   ;;  %s224_s3 = inlined_call_operand.hbm [shape: f32[16,16], index: 3, kind: output, shape index: {}]  }
   0x1   :  { %v20_v0 = vld [vmem:[%s222_s1 + $0x18] sm:$0xff]  ;;  %v19_v1 = vld [vmem:[%s222_s1 + $0x10] sm:$0xff]  ;;  %v15_v2 = vld [vmem:[%s221_s0] sm:$0xff] }
   0x2   :  { %138 = vmatprep.subr.mxu0 %v20_v0  ;;  %v18_v3 = vld [vmem:[%s222_s1 + $0x8] sm:$0xff]  ;;  %146 = vmatprep.mubr.msk.f32.mxu0 %vm28_vm0, %v15_v2 }
   0x3   :  { %139 = vmatpush3.msra.mxu0 %v20_v0 }
   0x4   :  { %8 = vsyncpa [#allocation3], 0  ;;  %140 = vmatprep.subr.mxu0 %v19_v1  ;;  %v17_v4 = vld [vmem:[%s222_s1] sm:$0xff]  ;;  %v16_v5 = vld [vmem:[%s221_s0 + $0x8] sm:$0xff]  ;;  %s174_s26 = smov [#allocation2]   ;;  %vm110_vm1 = vcmask 130048  }
   0x5   :  { %141 = vmatpush3.msra.mxu0 %v19_v1  ;;  %v129_v6 = vld [vmem:[%s223_s2] ss:$0 sm:$0xff]  ;;  %s118_s27 = sshll.u32 %s174_s26, 4  ;;  %s119_s27 = int_to_ptr.vmem [resolvable:$true] %s118_s27 }
   0x6   :  { %142 = vmatprep.subr.mxu0 %v18_v3  ;;  %s152_s1 = scalar_lea.vmem %s119_s27, 256  ;;  %p157_p1 = scmp.lt.s32.totalorder %s119_s27, %s119_s27 }
   0x7   :  { %143 = vmatpush3.msra.mxu0 %v18_v3  ;;  %p153_p0 = scmp.ne.s32.totalorder %s119_s27, %s152_s1  ;;  %p158_p2 = scmp.lt.s32.totalorder %s152_s1, %s152_s1 }
   0x8   :  { %144 = vmatprep.subr.mxu0 %v17_v4 }
   0x9   :  { %145 = vmatpush3.msra.mxu0 %v17_v4  ;;  %p159_p3 = por %p158_p2, %p157_p1 }
   0xa   :  { %147 = vmatmul.mubr.msk.f32.vlgmr.msra.gmra.mxu0 %vm28_vm0, %v16_v5 }
   0xb   :  { %p160_p4 = pnand %p159_p3, %p153_p0 }
  0xca   :  { %v148_v7 = vpop.f32.mrf.mxu0 }
  0xcb   :  { %v107_v8 = vadd.f32 %v148_v7, %v129_v6 }
  0xcc   :  { %v101_v9 = vpop.f32.mrf.mxu0 }
  0xcd   :  { %112 = vst.msk [vmem:[#allocation2 + $0x8] sm:$0xff] %vm110_vm1, %v107_v8  ;;  %v102_v10 = vadd.f32 %v129_v6, %v101_v9 }
  0xcf   :  { %111 = vst.msk [vmem:[#allocation2] sm:$0xff] %vm110_vm1, %v102_v10 }
  0xd0   :  { %163 = shalt.err (!%p160_p4)
}
  0xd1   :  { %s175_s0 = smov 128   ;;  %s176_s28 = smov 8  }
  0xd2   :  { %124 = dma.vmem_to_hbm [thread:$0]  %s119_s27, 256, %s224_s3, [#allocation3], %s175_s0, %s175_s0, %s176_s28  }
  0xd3   :  { %172 = dma.done.wait [#allocation3], 256  }
  0xd4   :  { %173 = vsyncadd [#allocation3], 4294967040 }
  0xd5   :  { %128 = vsyncpa [#allocation3], 1 }

</bundles_post_ra>
